<compile_context>
chip_gen: v5e
topology: v5e:2x2
jax: 0.10.0
libtpu: 0.0.40
codegen_flags: <defaults>
</compile_context>

<pallas_src>
import jax
import jax.numpy as jnp
from jax.experimental import pallas as pl
from jax.experimental.pallas import tpu as pltpu

D_IN, D_H1, D_H2, D_H3, D_OUT = 42, 32, 16, 8, 1
LANES = 128
MATMUL_DTYPE = jnp.bfloat16   # bf16 operands for the MXU (f32 accumulate).


def _round_up(n, m):
    return ((n + m - 1) // m) * m


def mlp_kernel(x_ref, w_ref, v_ref, o_ref):
    # x_ref : (TB, 128) bf16     padded input rows (lanes >= 42 are zero)
    # w_ref : (3, 128, 128) bf16 packed, padded fc1..fc3 weights (in, out)
    # v_ref : (8, 128) f32       row 0: fc4 weight row; rows 1-3: b1..b3;
    #                            row 4: fc4 bias in every lane; rows 5-7: zero
    # o_ref : (TB//128, 128) f32 compacted sigmoid output
    v = v_ref[...]
    h = x_ref[...]
    for i in range(3):  # fc1..fc3 on the MXU, f32 accumulation, f32 epilogue
        z = jnp.dot(h.astype(w_ref.dtype), w_ref[i],
                    preferred_element_type=jnp.float32) + v[i + 1:i + 2]
        h = jnp.maximum(z, 0.0)          # (TB, 128) f32; lanes >= 8 are zero

    # fc4 + output compaction.  For each 128-row group g:
    #   out[g, j] = sum_k w4[k] * h[g*128 + j, k]
    # computed as row 0 of (v[0:8] @ h_g^T); rows 1-7 of the product are junk
    # and discarded (the 8-row lhs keeps the matmul natively tile shaped).
    lhs = v[0:8]                         # (8, 128) f32, row 0 = fc4 weight row
    b4 = v[4:5]                          # (1, 128) f32, fc4 bias in every lane
    G = o_ref.shape[0]
    for g in range(G):
        hg = h[g * LANES:(g + 1) * LANES, :]                      # (128, 128)
        zg = jnp.dot(lhs, hg.T, preferred_element_type=jnp.float32)[0:1, :]
        zg = zg + b4                                              # (1, 128)
        o_ref[g:g + 1, :] = 1.0 / (1.0 + jnp.exp(-zg))            # exact sigmoid


def pack_params(params):
    """Pack the 4 Linear layers into one weight slab + one vector slab."""
    (w1, b1), (w2, b2), (w3, b3), (w4, b4) = params  # w_i stored as (in, out)

    w_slab = jnp.zeros((3, LANES, LANES), jnp.float32)
    w_slab = w_slab.at[0, :D_IN, :D_H1].set(w1)
    w_slab = w_slab.at[1, :D_H1, :D_H2].set(w2)
    w_slab = w_slab.at[2, :D_H2, :D_H3].set(w3)
    w_slab = w_slab.astype(MATMUL_DTYPE)

    v_slab = jnp.zeros((8, LANES), jnp.float32)
    v_slab = v_slab.at[0, :D_H3].set(w4[:, 0])   # fc4 weight as a row vector
    v_slab = v_slab.at[1, :D_H1].set(b1)
    v_slab = v_slab.at[2, :D_H2].set(b2)
    v_slab = v_slab.at[3, :D_H3].set(b3)
    v_slab = v_slab.at[4, :].set(b4[0])          # fc4 bias in every lane
    return w_slab, v_slab


def _choose_tile(batch):
    """Batch tile (multiple of 128) and padded batch size."""
    b128 = _round_up(batch, LANES)
    if b128 <= LANES:
        return LANES, LANES                       # one 128-row step
    # >= 2 grid steps so the "parallel" axis shards across both v7x TCs;
    # cap the tile at 1024 rows (amortizes ~0.35us/step, stays at HBM roofline).
    tb = min(1024, _round_up(pl.cdiv(b128, 2), LANES))
    return tb, _round_up(b128, tb)


def mlp_forward(x, packed):
    w_slab, v_slab = packed
    B = x.shape[0]
    TB, B_pad = _choose_tile(B)
    G = TB // LANES
    n_steps = B_pad // TB

    # bf16, 128-lane padded input (zero padding is inert through the network).
    x_pad = jnp.zeros((B_pad, LANES), MATMUL_DTYPE)
    x_pad = x_pad.at[:B, :D_IN].set(x.astype(MATMUL_DTYPE))

    out = pl.pallas_call(
        mlp_kernel,
        out_shape=jax.ShapeDtypeStruct((n_steps, G, LANES), jnp.float32),
        grid_spec=pltpu.PrefetchScalarGridSpec(
            num_scalar_prefetch=0,
            grid=(n_steps,),
            in_specs=[
                pl.BlockSpec((TB, LANES), lambda i: (i, 0)),           # x tile
                pl.BlockSpec((3, LANES, LANES), lambda i: (0, 0, 0)),  # weights (resident)
                pl.BlockSpec((8, LANES), lambda i: (0, 0)),            # bias/fc4 slab (resident)
            ],
            out_specs=pl.BlockSpec((None, G, LANES), lambda i: (i, 0, 0)),
        ),
        compiler_params=pltpu.CompilerParams(
            dimension_semantics=("parallel",)),
    )(x_pad, w_slab, v_slab)

    # out[i, g, j] is the result for batch row i*TB + g*128 + j.
    return out.reshape(B_pad, 1)[:B]


def init_linear(key, fan_in, fan_out):
    # Mimic PyTorch nn.Linear default init: U(-1/sqrt(fan_in), 1/sqrt(fan_in)).
    kw, kb = jax.random.split(key)
    bound = 1.0 / jnp.sqrt(float(fan_in))
    # Stored as (in, out) so the kernel computes x @ W.
    w = jax.random.uniform(kw, (fan_in, fan_out), jnp.float32, -bound, bound)
    b = jax.random.uniform(kb, (fan_out,), jnp.float32, -bound, bound)
    return w, b


def reference_forward(x, params):
    (w1, b1), (w2, b2), (w3, b3), (w4, b4) = params
    h = jnp.maximum(x @ w1 + b1, 0.0)
    h = jnp.maximum(h @ w2 + b2, 0.0)
    h = jnp.maximum(h @ w3 + b3, 0.0)
    return jax.nn.sigmoid(h @ w4 + b4)


if __name__ == "__main__":
    key = jax.random.PRNGKey(0)
    k_x1, k_x2, k1, k2, k3, k4 = jax.random.split(key, 6)

    params = (
        init_linear(k1, D_IN, D_H1),
        init_linear(k2, D_H1, D_H2),
        init_linear(k3, D_H2, D_H3),
        init_linear(k4, D_H3, D_OUT),
    )
    packed = pack_params(params)

    # B=8: single-step path; B=260: multi-step grid (2 steps), batch padding,
    # multi-group output compaction.
    for kx, B in ((k_x1, 8), (k_x2, 260)):
        x = jax.random.normal(kx, (B, D_IN), jnp.float32)
        out = jax.block_until_ready(mlp_forward(x, packed))
        ref = reference_forward(x, params)
        assert out.shape == (B, D_OUT), out.shape
        # Loose tolerance: kernel uses bf16 matmul operands (f32 accumulate);
        # reference is pure f32.
        assert jnp.allclose(out, ref, atol=2e-2, rtol=2e-2), f"mismatch at B={B}"

    print("KERNEL_OK")
</pallas_src>

<mosaic_0001>
module attributes {stable_mosaic.version = 11 : i64} {
  func.func @mlp_kernel(%arg0: i32, %arg1: memref<128x128xbf16, #tpu.memory_space<vmem>>, %arg2: memref<3x128x128xbf16, #tpu.memory_space<vmem>>, %arg3: memref<8x128xf32, #tpu.memory_space<vmem>>, %arg4: memref<1x1x128xf32, #tpu.memory_space<vmem>>) attributes {dimension_semantics = [#tpu.dimension_semantics<parallel>], iteration_bounds = array<i64: 1>, scalar_prefetch = 0 : i64, scratch_operands = 0 : i64, tpu.core_type = #tpu.core_type<tc>, window_params = [{transform_indices = @transform_0, window_bounds = array<i64: 128, 128>}, {pipeline_mode = #tpu.pipeline_mode<synchronous>, transform_indices = @transform_1, window_bounds = array<i64: 3, 128, 128>}, {pipeline_mode = #tpu.pipeline_mode<synchronous>, transform_indices = @transform_2, window_bounds = array<i64: 8, 128>}, {transform_indices = @transform_3, window_bounds = array<i64: 1, 1, 128>}]} {
    %c0 = arith.constant 0 : index
    %c0_0 = arith.constant 0 : index
    %0 = vector.load %arg3[%c0, %c0_0] : memref<8x128xf32, #tpu.memory_space<vmem>>, vector<8x128xf32>
    %c0_1 = arith.constant 0 : index
    %c0_2 = arith.constant 0 : index
    %1 = vector.load %arg1[%c0_1, %c0_2] : memref<128x128xbf16, #tpu.memory_space<vmem>>, vector<128x128xbf16>
    %c0_3 = arith.constant 0 : index
    %c0_4 = arith.constant 0 : index
    %c0_5 = arith.constant 0 : index
    %2 = vector.load %arg2[%c0_3, %c0_4, %c0_5] : memref<3x128x128xbf16, #tpu.memory_space<vmem>>, vector<1x128x128xbf16>
    %3 = vector.shape_cast %2 : vector<1x128x128xbf16> to vector<128x128xbf16>
    %cst = arith.constant dense<0.000000e+00> : vector<128x128xf32>
    %4 = tpu.matmul %1, %3, %cst {dimension_numbers = #tpu.dot_dimension_numbers<[1], [0], [0], [1], [0, 0, 1, 1], [], []>} : vector<128x128xbf16>, vector<128x128xbf16>, vector<128x128xf32> -> vector<128x128xf32>
    %5 = vector.extract_strided_slice %0 {offsets = [1, 0], sizes = [1, 128], strides = [1, 1]} : vector<8x128xf32> to vector<1x128xf32>
    %6 = vector.broadcast %5 : vector<1x128xf32> to vector<128x128xf32>
    %7 = arith.addf %4, %6 : vector<128x128xf32>
    %cst_6 = arith.constant 0.000000e+00 : f32
    %8 = vector.broadcast %cst_6 : f32 to vector<128x128xf32>
    %9 = arith.maximumf %7, %8 : vector<128x128xf32>
    %10 = arith.truncf %9 : vector<128x128xf32> to vector<128x128xbf16>
    %c1 = arith.constant 1 : index
    %c0_7 = arith.constant 0 : index
    %c0_8 = arith.constant 0 : index
    %11 = vector.load %arg2[%c1, %c0_7, %c0_8] : memref<3x128x128xbf16, #tpu.memory_space<vmem>>, vector<1x128x128xbf16>
    %12 = vector.shape_cast %11 : vector<1x128x128xbf16> to vector<128x128xbf16>
    %cst_9 = arith.constant dense<0.000000e+00> : vector<128x128xf32>
    %13 = tpu.matmul %10, %12, %cst_9 {dimension_numbers = #tpu.dot_dimension_numbers<[1], [0], [0], [1], [0, 0, 1, 1], [], []>} : vector<128x128xbf16>, vector<128x128xbf16>, vector<128x128xf32> -> vector<128x128xf32>
    %14 = vector.extract_strided_slice %0 {offsets = [2, 0], sizes = [1, 128], strides = [1, 1]} : vector<8x128xf32> to vector<1x128xf32>
    %15 = vector.broadcast %14 : vector<1x128xf32> to vector<128x128xf32>
    %16 = arith.addf %13, %15 : vector<128x128xf32>
    %cst_10 = arith.constant 0.000000e+00 : f32
    %17 = vector.broadcast %cst_10 : f32 to vector<128x128xf32>
    %18 = arith.maximumf %16, %17 : vector<128x128xf32>
    %19 = arith.truncf %18 : vector<128x128xf32> to vector<128x128xbf16>
    %c2 = arith.constant 2 : index
    %c0_11 = arith.constant 0 : index
    %c0_12 = arith.constant 0 : index
    %20 = vector.load %arg2[%c2, %c0_11, %c0_12] : memref<3x128x128xbf16, #tpu.memory_space<vmem>>, vector<1x128x128xbf16>
    %21 = vector.shape_cast %20 : vector<1x128x128xbf16> to vector<128x128xbf16>
    %cst_13 = arith.constant dense<0.000000e+00> : vector<128x128xf32>
    %22 = tpu.matmul %19, %21, %cst_13 {dimension_numbers = #tpu.dot_dimension_numbers<[1], [0], [0], [1], [0, 0, 1, 1], [], []>} : vector<128x128xbf16>, vector<128x128xbf16>, vector<128x128xf32> -> vector<128x128xf32>
    %23 = vector.extract_strided_slice %0 {offsets = [3, 0], sizes = [1, 128], strides = [1, 1]} : vector<8x128xf32> to vector<1x128xf32>
    %24 = vector.broadcast %23 : vector<1x128xf32> to vector<128x128xf32>
    %25 = arith.addf %22, %24 : vector<128x128xf32>
    %cst_14 = arith.constant 0.000000e+00 : f32
    %26 = vector.broadcast %cst_14 : f32 to vector<128x128xf32>
    %27 = arith.maximumf %25, %26 : vector<128x128xf32>
    %28 = vector.extract_strided_slice %0 {offsets = [4, 0], sizes = [1, 128], strides = [1, 1]} : vector<8x128xf32> to vector<1x128xf32>
    %29 = tpu.transpose %27, [1, 0] : vector<128x128xf32> -> vector<128x128xf32>
    %cst_15 = arith.constant dense<0.000000e+00> : vector<8x128xf32>
    %30 = tpu.matmul %0, %29, %cst_15 {dimension_numbers = #tpu.dot_dimension_numbers<[1], [0], [0], [1], [0, 0, 1, 1], [], []>} : vector<8x128xf32>, vector<128x128xf32>, vector<8x128xf32> -> vector<8x128xf32>
    %31 = vector.extract_strided_slice %30 {offsets = [0, 0], sizes = [1, 128], strides = [1, 1]} : vector<8x128xf32> to vector<1x128xf32>
    %32 = arith.addf %31, %28 : vector<1x128xf32>
    %cst_16 = arith.constant 0.000000e+00 : f32
    %33 = vector.broadcast %cst_16 : f32 to vector<1x128xf32>
    %34 = arith.subf %33, %32 : vector<1x128xf32>
    %35 = math.exp %34 : vector<1x128xf32>
    %cst_17 = arith.constant 1.000000e+00 : f32
    %36 = vector.broadcast %cst_17 : f32 to vector<1x128xf32>
    %37 = arith.addf %36, %35 : vector<1x128xf32>
    %cst_18 = arith.constant 1.000000e+00 : f32
    %38 = vector.broadcast %cst_18 : f32 to vector<1x128xf32>
    %39 = arith.divf %38, %37 : vector<1x128xf32>
    %c0_19 = arith.constant 0 : index
    %c0_20 = arith.constant 0 : index
    %c0_21 = arith.constant 0 : index
    %40 = vector.load %arg4[%c0_19, %c0_20, %c0_21] : memref<1x1x128xf32, #tpu.memory_space<vmem>>, vector<1x1x128xf32>
    %41 = vector.shape_cast %40 : vector<1x1x128xf32> to vector<1x128xf32>
    %42 = vector.shape_cast %39 : vector<1x128xf32> to vector<1x1x128xf32>
    tpu.vector_store %arg4[%c0_19, %c0_20, %c0_21], %42 {strides = array<i32>} : memref<1x1x128xf32, #tpu.memory_space<vmem>>, vector<1x1x128xf32>,
    return
  }
  func.func @transform_0(%arg0: i32) -> (i32, i32) {
    %c0_i32 = arith.constant 0 : i32
    %c0_i32_0 = arith.constant 0 : i32
    return %arg0, %c0_i32 : i32, i32
  }
  func.func @transform_1(%arg0: i32) -> (i32, i32, i32) {
    %c0_i32 = arith.constant 0 : i32
    %c0_i32_0 = arith.constant 0 : i32
    %c0_i32_1 = arith.constant 0 : i32
    %c0_i32_2 = arith.constant 0 : i32
    return %c0_i32, %c0_i32_0, %c0_i32_1 : i32, i32, i32
  }
  func.func @transform_2(%arg0: i32) -> (i32, i32) {
    %c0_i32 = arith.constant 0 : i32
    %c0_i32_0 = arith.constant 0 : i32
    %c0_i32_1 = arith.constant 0 : i32
    return %c0_i32, %c0_i32_0 : i32, i32
  }
  func.func @transform_3(%arg0: i32) -> (i32, i32, i32) {
    %c0_i32 = arith.constant 0 : i32
    %c0_i32_0 = arith.constant 0 : i32
    %c0_i32_1 = arith.constant 0 : i32
    return %arg0, %c0_i32, %c0_i32_0 : i32, i32, i32
  }
}

</mosaic_0001>

<bundles_post_ra>
// kernel: tpu_custom_call.1
= control target key start
LH: loop header
LB: loop body
LE: loop exit
PB: predicated region body
PF: predicated region fallthrough
CT: control target
= control target key end

     0   :  { %8 = vsyncpa [#allocation3], 0  ;;  %s954_s0 = inlined_call_operand.hbm [shape: bf16[128,128], index: 0, kind: input, shape index: {}]   ;;  %s955_s1 = inlined_call_operand.hbm [shape: bf16[3,128,128], index: 1, kind: input, shape index: {}]   ;;  %s956_s2 = inlined_call_operand.hbm [shape: f32[8,128], index: 2, kind: input, shape index: {}]   ;;  %s957_s3 = inlined_call_operand.hbm [shape: f32[1,1,128], index: 3, kind: output, shape index: {}]  }
   0x1   :  { %9 = vsyncpa [#allocation6], 0 }
   0x2   :  { %10 = vsyncpa [#allocation4], 0  ;;  %s28_s14 = sshll.u32 %s955_s1, 4  ;;  %s891_s15 = smov [#allocation5]   ;;  %s29_s14 = int_to_ptr.hbm [resolvable:$true] %s28_s14 }
   0x3   :  { %s30_s16 = sshll.u32 %s891_s15, 4  ;;  %s15_s19 = sshll.u32 %s954_s0, 4  ;;  %s31_s16 = int_to_ptr.vmem [resolvable:$true] %s30_s16  ;;  %s16_s19 = int_to_ptr.hbm [resolvable:$true] %s15_s19 }
   0x4   :  { %s892_s20 = smov 64   ;;  %s893_s21 = smov 4  }
   0x5   :  { %36 = dma.hbm_to_vmem [thread:$0]  %s29_s14, 3072, %s31_s16, [#allocation6], %s892_s20, %s892_s20, %s893_s21  }
   0x6   :  { %s894_s22 = smov [#allocation2]   ;;  %s42_s26 = sshll.u32 %s956_s2, 4  ;;  %s43_s26 = int_to_ptr.hbm [resolvable:$true] %s42_s26 }
   0x7   :  { %s17_s23 = sshll.u32 %s894_s22, 4  ;;  %s895_s1 = smov [#allocation7]   ;;  %s18_s23 = int_to_ptr.vmem [resolvable:$true] %s17_s23 }
   0x8   :  { %23 = dma.hbm_to_vmem [thread:$0]  %s16_s19, 1024, %s18_s23, [#allocation3], %s892_s20, %s892_s20, %s893_s21  }
   0x9   :  { %s44_s27 = sshll.u32 %s895_s1, 4  ;;  %s45_s27 = int_to_ptr.vmem [resolvable:$true] %s44_s27 }
   0xa   :  { %47 = dma.hbm_to_vmem [thread:$0]  %s43_s26, 128, %s45_s27, [#allocation6]  }
   0xb   :  { %885 = dma.done.wait [#allocation3], 1024  }
   0xc   :  { %886 = vsyncadd [#allocation3], 4294966272 }
   0xd   :  { %887 = dma.done.wait [#allocation6], 3200  }
   0xe   :  { %888 = vsyncadd [#allocation6], 4294964096  ;;  %v738_v0 = vld [vmem:[#allocation5 + $0x38] sm:$0xff]  ;;  %v737_v1 = vld [vmem:[#allocation5 + $0x30] sm:$0xff]  ;;  %s896_s0 = smov [#allocation8]   ;;  %s584_s30 = sshll.u32 %s957_s3, 4  ;;  %s585_s30 = int_to_ptr.hbm [resolvable:$true] %s584_s30 }
   0xf   :  { %190 = vmatpush.bf16.msra.mxu0 %v738_v0  ;;  %755 = vmatpush.bf16.msra.mxu3 %v738_v0  ;;  %v736_v2 = vld [vmem:[#allocation5 + $0x28] sm:$0xff]  ;;  %v735_v3 = vld [vmem:[#allocation5 + $0x20] sm:$0xff]  ;;  %v734_v4 = vld [vmem:[#allocation5 + $0x18] sm:$0xff]  ;;  %s582_s2 = sshll.u32 %s896_s0, 4  ;;  %s583_s2 = int_to_ptr.vmem [resolvable:$true] %s582_s2 }
  0x10   :  { %v733_v5 = vld [vmem:[#allocation5 + $0x10] sm:$0xff]  ;;  %v732_v6 = vld [vmem:[#allocation5 + $0x8] sm:$0xff]  ;;  %v731_v7 = vld [vmem:[#allocation5] sm:$0xff] }
  0x11   :  { %v723_v8 = vld [vmem:[#allocation2] sm:$0xff]  ;;  %v724_v9 = vld [vmem:[#allocation2 + $0x8] sm:$0xff]  ;;  %v725_v11 = vld [vmem:[#allocation2 + $0x10] sm:$0xff] }
  0x12   :  { %v727_v10 = vld [vmem:[#allocation2 + $0x20] sm:$0xff]  ;;  %v728_v12 = vld [vmem:[#allocation2 + $0x28] sm:$0xff]  ;;  %v746_v13 = vld [vmem:[#allocation5 + $0x78] sm:$0xff] }
  0x13   :  { %191 = vmatpush.bf16.msra.mxu0 %v737_v1  ;;  %756 = vmatpush.bf16.msra.mxu3 %v737_v1  ;;  %v745_v14 = vld [vmem:[#allocation5 + $0x70] sm:$0xff]  ;;  %v744_v15 = vld [vmem:[#allocation5 + $0x68] sm:$0xff]  ;;  %v726_v16 = vld [vmem:[#allocation2 + $0x18] sm:$0xff] }
  0x14   :  { %763 = vmatpush.bf16.msra.mxu1 %v746_v13  ;;  %v743_v17 = vld [vmem:[#allocation5 + $0x60] sm:$0xff]  ;;  %v729_v18 = vld [vmem:[#allocation2 + $0x30] sm:$0xff]  ;;  %v730_v19 = vld [vmem:[#allocation2 + $0x38] sm:$0xff] }
  0x15   :  { %v742_v20 = vld [vmem:[#allocation5 + $0x58] sm:$0xff]  ;;  %v741_v21 = vld [vmem:[#allocation5 + $0x50] sm:$0xff]  ;;  %v740_v22 = vld [vmem:[#allocation5 + $0x48] sm:$0xff] }
  0x16   :  { %v739_v23 = vld [vmem:[#allocation5 + $0x40] sm:$0xff]  ;;  %v754_v63 = vld [vmem:[#allocation5 + $0xb8] sm:$0xff] }
  0x17   :  { %192 = vmatpush.bf16.msra.mxu0 %v736_v2  ;;  %757 = vmatpush.bf16.msra.mxu3 %v736_v2  ;;  %v926_v24 = vld [vmem:[#allocation7] sm:$0xff] }
  0x18   :  { %764 = vmatpush.bf16.msra.mxu1 %v745_v14  ;;  %v929_v26 = vperm.slane %v926_v24, 1  ;;  %771 = vmatpush.bf16.msra.mxu2 %v754_v63 }
  0x1b   :  { %193 = vmatpush.bf16.msra.mxu0 %v735_v3  ;;  %758 = vmatpush.bf16.msra.mxu3 %v735_v3 }
  0x1c   :  { %765 = vmatpush.bf16.msra.mxu1 %v744_v15 }
  0x1f   :  { %194 = vmatpush.bf16.msra.mxu0 %v734_v4  ;;  %759 = vmatpush.bf16.msra.mxu3 %v734_v4 }
  0x20   :  { %766 = vmatpush.bf16.msra.mxu1 %v743_v17 }
  0x23   :  { %195 = vmatpush.bf16.msra.mxu0 %v733_v5  ;;  %760 = vmatpush.bf16.msra.mxu3 %v733_v5 }
  0x24   :  { %767 = vmatpush.bf16.msra.mxu1 %v742_v20 }
  0x27   :  { %196 = vmatpush.bf16.msra.mxu0 %v732_v6  ;;  %761 = vmatpush.bf16.msra.mxu3 %v732_v6 }
  0x28   :  { %768 = vmatpush.bf16.msra.mxu1 %v741_v21 }
  0x2b   :  { %197 = vmatpush.bf16.msra.mxu0 %v731_v7  ;;  %762 = vmatpush.bf16.msra.mxu3 %v731_v7  ;;  %v753_v7 = vld [vmem:[#allocation5 + $0xb0] sm:$0xff] }
  0x2c   :  { %769 = vmatpush.bf16.msra.mxu1 %v740_v22  ;;  %772 = vmatpush.bf16.msra.mxu2 %v753_v7 }
  0x2e   :  { %198 = vmatmul.bf16.vlgmr.msra.gmra.mxu0 %v723_v8  ;;  %218 = vmatmul.bf16.vlgmr.msra.gmra.mxu3 %v727_v10  ;;  %v752_v8 = vld [vmem:[#allocation5 + $0xa8] sm:$0xff] }
  0x2f   :  { %329 = vmatpush.bf16.msrb.mxu0 %v746_v13 }
  0x30   :  { %770 = vmatpush.bf16.msra.mxu1 %v739_v23  ;;  %773 = vmatpush.bf16.msra.mxu2 %v752_v8 }
  0x33   :  { %330 = vmatpush.bf16.msrb.mxu0 %v745_v14 }
  0x37   :  { %331 = vmatpush.bf16.msrb.mxu0 %v744_v15  ;;  %v750_v15 = vld [vmem:[#allocation5 + $0x98] sm:$0xff] }
  0x3b   :  { %332 = vmatpush.bf16.msrb.mxu0 %v743_v17  ;;  %v749_v17 = vld [vmem:[#allocation5 + $0x90] sm:$0xff] }
  0x3e   :  { %203 = vmatmul.bf16.gmra.mxu0 %v724_v9  ;;  %223 = vmatmul.bf16.gmra.mxu3 %v728_v12  ;;  %v751_v9 = vld [vmem:[#allocation5 + $0xa0] sm:$0xff] }
  0x3f   :  { %333 = vmatpush.bf16.msrb.mxu0 %v742_v20  ;;  %774 = vmatpush.bf16.msra.mxu2 %v751_v9 }
  0x43   :  { %334 = vmatpush.bf16.msrb.mxu0 %v741_v21  ;;  %775 = vmatpush.bf16.msra.mxu2 %v750_v15 }
  0x47   :  { %335 = vmatpush.bf16.msrb.mxu0 %v740_v22  ;;  %776 = vmatpush.bf16.msra.mxu2 %v749_v17  ;;  %v747_v22 = vld [vmem:[#allocation5 + $0x80] sm:$0xff] }
  0x4b   :  { %336 = vmatpush.bf16.msrb.mxu0 %v739_v23 }
  0x4e   :  { %208 = vmatmul.bf16.gmra.mxu0 %v725_v11  ;;  %228 = vmatmul.bf16.gmra.mxu3 %v729_v18 }
  0x4f   :  { %468 = vmatpush.bf16.msra.mxu0 %v754_v63 }
  0x53   :  { %469 = vmatpush.bf16.msra.mxu0 %v753_v7 }
  0x57   :  { %470 = vmatpush.bf16.msra.mxu0 %v752_v8 }
  0x5b   :  { %471 = vmatpush.bf16.msra.mxu0 %v751_v9 }
  0x5e   :  { %213 = vmatmul.bf16.gmra.mxu0 %v726_v16  ;;  %233 = vmatmul.bf16.gmra.mxu3 %v730_v19  ;;  %v748_v19 = vld [vmem:[#allocation5 + $0x88] sm:$0xff] }
  0x5f   :  { %472 = vmatpush.bf16.msra.mxu0 %v750_v15  ;;  %777 = vmatpush.bf16.msra.mxu2 %v748_v19 }
  0x63   :  { %473 = vmatpush.bf16.msra.mxu0 %v749_v17  ;;  %778 = vmatpush.bf16.msra.mxu2 %v747_v22 }
  0x67   :  { %474 = vmatpush.bf16.msra.mxu0 %v748_v19 }
  0x6b   :  { %475 = vmatpush.bf16.msra.mxu0 %v747_v22 }
  0xab   :  { %v199_v25 = vpop.f32.mrf.mxu0 }
  0xac   :  { %v200_v27 = vadd.f32 %v199_v25, %v929_v26 }
  0xae   :  { %v239_v30 = vmax.f32 %v200_v27, 0.0 }
  0xb1   :  { %v219_v46 = vpop.f32.mrf.mxu3 }
  0xb2   :  { %v220_v57 = vadd.f32 %v219_v46, %v929_v26 }
  0xb3   :  { %v201_v28 = vpop.f32.mrf.mxu0 }
  0xb4   :  { %v202_v29 = vadd.f32 %v201_v28, %v929_v26  ;;  %v247_v59 = vmax.f32 %v220_v57, 0.0 }
  0xb6   :  { %v240_v31 = vmax.f32 %v202_v29, 0.0  ;;  %v280_v29 = vperm.slane %v926_v24, 2 }
  0xb8   :  { %v255_v32 = vpack.c.bf16 %v240_v31, %v239_v30 }
  0xb9   :  { %v221_v49 = vpop.f32.mrf.mxu3 }
  0xba   :  { %337 = vmatmul.bf16.vlgmr.msrb.gmra.mxu0 %v255_v32  ;;  %v222_v58 = vadd.f32 %v221_v49, %v929_v26 }
  0xbb   :  { %v204_v33 = vpop.f32.mrf.mxu0 }
  0xbc   :  { %v205_v34 = vadd.f32 %v204_v33, %v929_v26  ;;  %v248_v60 = vmax.f32 %v222_v58, 0.0 }
  0xbe   :  { %v241_v37 = vmax.f32 %v205_v34, 0.0  ;;  %v259_v62 = vpack.c.bf16 %v248_v60, %v247_v59 }
  0xc1   :  { %v224_v56 = vpop.f32.mrf.mxu3 }
  0xc2   :  { %v225_v1 = vadd.f32 %v224_v56, %v929_v26 }
  0xc3   :  { %v206_v35 = vpop.f32.mrf.mxu0 }
  0xc4   :  { %v207_v36 = vadd.f32 %v206_v35, %v929_v26  ;;  %v249_v3 = vmax.f32 %v225_v1, 0.0 }
  0xc6   :  { %v242_v38 = vmax.f32 %v207_v36, 0.0 }
  0xc8   :  { %v256_v39 = vpack.c.bf16 %v242_v38, %v241_v37 }
  0xc9   :  { %v226_v61 = vpop.f32.mrf.mxu3 }
  0xca   :  { %342 = vmatmul.bf16.vlgmr.msra.gmra.mxu1 %v256_v39  ;;  %v227_v2 = vadd.f32 %v226_v61, %v929_v26 }
  0xcb   :  { %v209_v40 = vpop.f32.mrf.mxu0 }
  0xcc   :  { %v210_v41 = vadd.f32 %v209_v40, %v929_v26  ;;  %v250_v4 = vmax.f32 %v227_v2, 0.0 }
  0xce   :  { %v243_v44 = vmax.f32 %v210_v41, 0.0  ;;  %v260_v5 = vpack.c.bf16 %v250_v4, %v249_v3 }
  0xd1   :  { %v229_v0 = vpop.f32.mrf.mxu3 }
  0xd2   :  { %v230_v10 = vadd.f32 %v229_v0, %v929_v26 }
  0xd3   :  { %v211_v42 = vpop.f32.mrf.mxu0 }
  0xd4   :  { %v212_v43 = vadd.f32 %v211_v42, %v929_v26  ;;  %v251_v13 = vmax.f32 %v230_v10, 0.0 }
  0xd6   :  { %v244_v45 = vmax.f32 %v212_v43, 0.0 }
  0xd8   :  { %v257_v47 = vpack.c.bf16 %v244_v45, %v243_v44 }
  0xd9   :  { %v231_v6 = vpop.f32.mrf.mxu3 }
  0xda   :  { %347 = vmatmul.bf16.gmra.mxu1 %v257_v47  ;;  %v232_v11 = vadd.f32 %v231_v6, %v929_v26 }
  0xdb   :  { %v214_v48 = vpop.f32.mrf.mxu0 }
  0xdc   :  { %v215_v50 = vadd.f32 %v214_v48, %v929_v26  ;;  %v252_v14 = vmax.f32 %v232_v11, 0.0 }
  0xde   :  { %v245_v53 = vmax.f32 %v215_v50, 0.0  ;;  %v261_v16 = vpack.c.bf16 %v252_v14, %v251_v13 }
  0xe1   :  { %v234_v12 = vpop.f32.mrf.mxu3 }
  0xe2   :  { %v235_v20 = vadd.f32 %v234_v12, %v929_v26 }
  0xe3   :  { %v216_v51 = vpop.f32.mrf.mxu0 }
  0xe4   :  { %v217_v52 = vadd.f32 %v216_v51, %v929_v26  ;;  %v253_v23 = vmax.f32 %v235_v20, 0.0 }
  0xe6   :  { %v246_v54 = vmax.f32 %v217_v52, 0.0 }
  0xe8   :  { %v258_v55 = vpack.c.bf16 %v246_v54, %v245_v53 }
  0xe9   :  { %v236_v18 = vpop.f32.mrf.mxu3 }
  0xea   :  { %352 = vmatmul.bf16.gmra.mxu1 %v258_v55  ;;  %v237_v21 = vadd.f32 %v236_v18, %v929_v26 }
  0xec   :  { %v254_v25 = vmax.f32 %v237_v21, 0.0 }
  0xee   :  { %v262_v27 = vpack.c.bf16 %v254_v25, %v253_v23 }
  0xfa   :  { %357 = vmatmul.bf16.gmra.mxu1 %v259_v62 }
 0x10a   :  { %362 = vmatmul.bf16.gmra.mxu1 %v260_v5 }
 0x11a   :  { %367 = vmatmul.bf16.gmra.mxu1 %v261_v16 }
 0x12a   :  { %372 = vmatmul.bf16.gmra.mxu1 %v262_v27 }
 0x137   :  { %v338_v28 = vpop.f32.mrf.mxu0 }
 0x138   :  { %v339_v30 = vadd.f32 %v338_v28, %v280_v29 }
 0x13a   :  { %v378_v33 = vmax.f32 %v339_v30, 0.0 }
 0x13f   :  { %v340_v31 = vpop.f32.mrf.mxu0 }
 0x140   :  { %v341_v32 = vadd.f32 %v340_v31, %v280_v29 }
 0x142   :  { %v379_v34 = vmax.f32 %v341_v32, 0.0 }
 0x144   :  { %v394_v35 = vpack.c.bf16 %v379_v34, %v378_v33 }
 0x146   :  { %476 = vmatmul.bf16.vlgmr.msra.gmra.mxu0 %v394_v35 }
 0x147   :  { %v343_v36 = vpop.f32.mrf.mxu1 }
 0x148   :  { %v344_v37 = vadd.f32 %v343_v36, %v280_v29  ;;  %v419_v36 = vperm.slane %v926_v24, 3 }
 0x14a   :  { %v380_v39 = vmax.f32 %v344_v37, 0.0 }
 0x14f   :  { %v345_v26 = vpop.f32.mrf.mxu1 }
 0x150   :  { %v346_v38 = vadd.f32 %v345_v26, %v280_v29 }
 0x152   :  { %v381_v40 = vmax.f32 %v346_v38, 0.0 }
 0x154   :  { %v395_v41 = vpack.c.bf16 %v381_v40, %v380_v39 }
 0x156   :  { %481 = vmatmul.bf16.vlgmr.msra.gmra.mxu2 %v395_v41 }
 0x157   :  { %v348_v42 = vpop.f32.mrf.mxu1 }
 0x158   :  { %v349_v43 = vadd.f32 %v348_v42, %v280_v29 }
 0x15a   :  { %v382_v46 = vmax.f32 %v349_v43, 0.0 }
 0x15f   :  { %v350_v44 = vpop.f32.mrf.mxu1 }
 0x160   :  { %v351_v45 = vadd.f32 %v350_v44, %v280_v29 }
 0x162   :  { %v383_v47 = vmax.f32 %v351_v45, 0.0 }
 0x164   :  { %v396_v48 = vpack.c.bf16 %v383_v47, %v382_v46 }
 0x166   :  { %486 = vmatmul.bf16.gmra.mxu2 %v396_v48 }
 0x167   :  { %v353_v49 = vpop.f32.mrf.mxu1 }
 0x168   :  { %v354_v50 = vadd.f32 %v353_v49, %v280_v29 }
 0x16a   :  { %v384_v53 = vmax.f32 %v354_v50, 0.0 }
 0x16f   :  { %v355_v51 = vpop.f32.mrf.mxu1 }
 0x170   :  { %v356_v52 = vadd.f32 %v355_v51, %v280_v29 }
 0x172   :  { %v385_v54 = vmax.f32 %v356_v52, 0.0 }
 0x174   :  { %v397_v55 = vpack.c.bf16 %v385_v54, %v384_v53 }
 0x176   :  { %491 = vmatmul.bf16.gmra.mxu2 %v397_v55 }
 0x177   :  { %v358_v56 = vpop.f32.mrf.mxu1 }
 0x178   :  { %v359_v57 = vadd.f32 %v358_v56, %v280_v29 }
 0x17a   :  { %v386_v60 = vmax.f32 %v359_v57, 0.0 }
 0x17f   :  { %v360_v58 = vpop.f32.mrf.mxu1 }
 0x180   :  { %v361_v59 = vadd.f32 %v360_v58, %v280_v29 }
 0x182   :  { %v387_v61 = vmax.f32 %v361_v59, 0.0 }
 0x184   :  { %v398_v62 = vpack.c.bf16 %v387_v61, %v386_v60 }
 0x186   :  { %496 = vmatmul.bf16.gmra.mxu2 %v398_v62 }
 0x187   :  { %v363_v63 = vpop.f32.mrf.mxu1 }
 0x188   :  { %v364_v0 = vadd.f32 %v363_v63, %v280_v29 }
 0x18a   :  { %v388_v3 = vmax.f32 %v364_v0, 0.0 }
 0x18f   :  { %v365_v1 = vpop.f32.mrf.mxu1 }
 0x190   :  { %v366_v2 = vadd.f32 %v365_v1, %v280_v29 }
 0x192   :  { %v389_v4 = vmax.f32 %v366_v2, 0.0 }
 0x194   :  { %v399_v5 = vpack.c.bf16 %v389_v4, %v388_v3 }
 0x196   :  { %501 = vmatmul.bf16.gmra.mxu2 %v399_v5 }
 0x197   :  { %v368_v6 = vpop.f32.mrf.mxu1 }
 0x198   :  { %v369_v7 = vadd.f32 %v368_v6, %v280_v29  ;;  %v554_v6 = vrot.slane %v926_v24, 4 }
 0x19a   :  { %v390_v10 = vmax.f32 %v369_v7, 0.0 }
 0x19f   :  { %v370_v8 = vpop.f32.mrf.mxu1 }
 0x1a0   :  { %v371_v9 = vadd.f32 %v370_v8, %v280_v29 }
 0x1a2   :  { %v391_v11 = vmax.f32 %v371_v9, 0.0 }
 0x1a4   :  { %v400_v12 = vpack.c.bf16 %v391_v11, %v390_v10 }
 0x1a6   :  { %506 = vmatmul.bf16.gmra.mxu2 %v400_v12 }
 0x1a7   :  { %v373_v13 = vpop.f32.mrf.mxu1 }
 0x1a8   :  { %v374_v14 = vadd.f32 %v373_v13, %v280_v29 }
 0x1aa   :  { %v392_v17 = vmax.f32 %v374_v14, 0.0 }
 0x1af   :  { %v375_v15 = vpop.f32.mrf.mxu1 }
 0x1b0   :  { %v376_v16 = vadd.f32 %v375_v15, %v280_v29 }
 0x1b2   :  { %v393_v18 = vmax.f32 %v376_v16, 0.0 }
 0x1b4   :  { %v401_v19 = vpack.c.bf16 %v393_v18, %v392_v17 }
 0x1b6   :  { %511 = vmatmul.bf16.gmra.mxu2 %v401_v19 }
 0x1c3   :  { %v477_v57 = vpop.f32.mrf.mxu0 }
 0x1c4   :  { %v478_v3 = vadd.f32 %v477_v57, %v419_v36 }
 0x1c6   :  { %v517_v5 = vmax.f32 %v478_v3, 0.0 }
 0x1cb   :  { %v479_v0 = vpop.f32.mrf.mxu0 }
 0x1cc   :  { %v480_v1 = vadd.f32 %v479_v0, %v419_v36 }
 0x1ce   :  { %v518_v4 = vmax.f32 %v480_v1, 0.0 }
 0x1d9   :  { %v482_v20 = vpop.f32.mrf.mxu2 }
 0x1da   :  { %v483_v62 = vadd.f32 %v482_v20, %v419_v36 }
 0x1dc   :  { %v519_v2 = vmax.f32 %v483_v62, 0.0 }
 0x1e1   :  { %v484_v21 = vpop.f32.mrf.mxu2 }
 0x1e2   :  { %v485_v60 = vadd.f32 %v484_v21, %v419_v36 }
 0x1e4   :  { %v520_v63 = vmax.f32 %v485_v60, 0.0 }
 0x1e9   :  { %v487_v22 = vpop.f32.mrf.mxu2 }
 0x1ea   :  { %v488_v58 = vadd.f32 %v487_v22, %v419_v36 }
 0x1ec   :  { %v521_v61 = vmax.f32 %v488_v58, 0.0 }
 0x1f1   :  { %v489_v23 = vpop.f32.mrf.mxu2 }
 0x1f2   :  { %v490_v55 = vadd.f32 %v489_v23, %v419_v36 }
 0x1f4   :  { %v522_v59 = vmax.f32 %v490_v55, 0.0 }
 0x1f9   :  { %v492_v25 = vpop.f32.mrf.mxu2 }
 0x1fa   :  { %v493_v53 = vadd.f32 %v492_v25, %v419_v36 }
 0x1fc   :  { %v523_v56 = vmax.f32 %v493_v53, 0.0 }
 0x201   :  { %v494_v27 = vpop.f32.mrf.mxu2 }
 0x202   :  { %v495_v51 = vadd.f32 %v494_v27, %v419_v36 }
 0x204   :  { %v524_v54 = vmax.f32 %v495_v51, 0.0 }
 0x209   :  { %v497_v28 = vpop.f32.mrf.mxu2 }
 0x20a   :  { %v498_v49 = vadd.f32 %v497_v28, %v419_v36 }
 0x20c   :  { %v525_v52 = vmax.f32 %v498_v49, 0.0 }
 0x211   :  { %v499_v30 = vpop.f32.mrf.mxu2 }
 0x212   :  { %v500_v47 = vadd.f32 %v499_v30, %v419_v36 }
 0x214   :  { %v526_v50 = vmax.f32 %v500_v47, 0.0 }
 0x219   :  { %v502_v31 = vpop.f32.mrf.mxu2 }
 0x21a   :  { %v503_v45 = vadd.f32 %v502_v31, %v419_v36 }
 0x21c   :  { %v527_v48 = vmax.f32 %v503_v45, 0.0 }
 0x221   :  { %v504_v32 = vpop.f32.mrf.mxu2 }
 0x222   :  { %v505_v43 = vadd.f32 %v504_v32, %v419_v36 }
 0x224   :  { %v528_v46 = vmax.f32 %v505_v43, 0.0 }
 0x229   :  { %v507_v33 = vpop.f32.mrf.mxu2 }
 0x22a   :  { %v508_v41 = vadd.f32 %v507_v33, %v419_v36 }
 0x22c   :  { %v529_v44 = vmax.f32 %v508_v41, 0.0 }
 0x231   :  { %v509_v34 = vpop.f32.mrf.mxu2 }
 0x232   :  { %v510_v39 = vadd.f32 %v509_v34, %v419_v36 }
 0x234   :  { %v530_v42 = vmax.f32 %v510_v39, 0.0 }
 0x239   :  { %v512_v35 = vpop.f32.mrf.mxu2 }
 0x23a   :  { %v513_v26 = vadd.f32 %v512_v35, %v419_v36 }
 0x23c   :  { %v531_v40 = vmax.f32 %v513_v26, 0.0 }
 0x241   :  { %v514_v29 = vpop.f32.mrf.mxu2 }
 0x242   :  { %v515_v37 = vadd.f32 %v514_v29, %v419_v36 }
 0x244   :  { %v532_v38 = vmax.f32 %v515_v37, 0.0 }
 0x246   :  { %533 = vmatpush.xpose.msrb.mxu3 %v532_v38 }
 0x24a   :  { %534 = vmatpush.xpose.msrb.mxu3 %v531_v40 }
 0x24e   :  { %535 = vmatpush.xpose.msrb.mxu3 %v530_v42 }
 0x252   :  { %536 = vmatpush.xpose.msrb.mxu3 %v529_v44 }
 0x256   :  { %537 = vmatpush.xpose.msrb.mxu3 %v528_v46 }
 0x25a   :  { %538 = vmatpush.xpose.msrb.mxu3 %v527_v48 }
 0x25e   :  { %539 = vmatpush.xpose.msrb.mxu3 %v526_v50 }
 0x262   :  { %540 = vmatpush.xpose.msrb.mxu3 %v525_v52 }
 0x266   :  { %541 = vmatpush.xpose.msrb.mxu3 %v524_v54 }
 0x26a   :  { %542 = vmatpush.xpose.msrb.mxu3 %v523_v56 }
 0x26e   :  { %543 = vmatpush.xpose.msrb.mxu3 %v522_v59 }
 0x272   :  { %544 = vmatpush.xpose.msrb.mxu3 %v521_v61 }
 0x276   :  { %545 = vmatpush.xpose.msrb.mxu3 %v520_v63 }
 0x27a   :  { %546 = vmatpush.xpose.msrb.mxu3 %v519_v2 }
 0x27e   :  { %547 = vmatpush.xpose.msrb.mxu3 %v518_v4 }
 0x282   :  { %548 = vmatpush.xpose.msrb.mxu3 %v517_v5 }
 0x285   :  { %549 = vmatmul.f32.vlgmr.msrb.gmra.mxu3 %v926_v24 }
 0x308   :  { %v550_v7 = vpop.f32.mrf.mxu3 }
 0x309   :  { %v556_v8 = vadd.f32 %v554_v6, %v550_v7 }
 0x30b   :  { %v557_v9 = vsub.f32 0.0, %v556_v8 }
 0x30d   :  { %v558_v10 = vmul.f32 1.442695, %v557_v9 }
 0x30f   :  { %785 = vpow2.f32 %v558_v10 }
 0x315   :  { %v786_v11 = vpop.eup %785 }
 0x316   :  { %v560_v12 = vadd.f32 1.0, %v786_v11 }
 0x318   :  { %787 = vrcp.f32 %v560_v12  ;;  %v572_v16 = vand.u32 2147483648, %v560_v12  ;;  %v570_v18 = vand.u32 2147483647, %v560_v12  ;;  %vm566_vm1 = vweird.f32 %v560_v12 }
 0x31a   :  { %v573_v19 = vor.u32 1.1754944e-38, %v572_v16  ;;  %vm571_vm3 = vcmp.eq.f32.partialorder %v570_v18, 8.507059e+37 }
 0x31e   :  { %v788_v13 = vpop.eup %787 }
 0x31f   :  { %v562_v14 = vmul.f32 %v788_v13, %v560_v12  ;;  %vm567_vm0 = vweird.f32 %v788_v13 }
 0x320   :  { %vm568_vm2 = vmor %vm566_vm1, %vm567_vm0 }
 0x321   :  { %v563_v15 = vsub.f32 1.0, %v562_v14 }
 0x323   :  { %v564_v17 = vmul.f32 %v788_v13, %v563_v15 }
 0x325   :  { %v565_v24 = vadd.f32 %v788_v13, %v564_v17 }
 0x327   :  { %v569_v20 = vsel %vm568_vm2, %v788_v13, %v565_v24 }
 0x328   :  { %v574_v21 = vsel %vm571_vm3, %v573_v19, %v569_v20 }
 0x329   :  { %576 = vst [vmem:[#allocation8] sm:$0x1] %v574_v21 }
 0x32a   :  { %587 = dma.vmem_to_hbm [thread:$0]  %s583_s2, 16, %s585_s30, [#allocation4]  }
 0x32b   :  { %889 = dma.done.wait [#allocation4], 16  }
 0x32c   :  { %890 = vsyncadd [#allocation4], 4294967280 }
 0x32d   :  { %592 = vsyncpa [#allocation3], 1 }
 0x32e   :  { %593 = vsyncpa [#allocation6], 1 }
 0x32f   :  { %594 = vsyncpa [#allocation4], 1 }

</bundles_post_ra>
